<compile_context>
chip_gen: v6e
topology: v6e:2x2x1
jax: 0.10.0
libtpu: 0.0.40
codegen_flags: <defaults>
</compile_context>

<pallas_src>
import functools
import math

import jax
import jax.numpy as jnp
from jax import lax
from jax.experimental import pallas as pl
from jax.experimental.pallas import tpu as pltpu


def _cdiv(a, b):
    return (a + b - 1) // b


def _round_up(x, m):
    return _cdiv(x, m) * m


# ---------------------------------------------------------------------------
# Linear: y = x @ W + b   (W stored as (in, out))
# ---------------------------------------------------------------------------
def linear_kernel(x_ref, w_ref, b_ref, o_ref):
    # Native-dtype operands (bf16 stays bf16), f32 accumulation on the MXU.
    y = jnp.dot(x_ref[...], w_ref[...], preferred_element_type=jnp.float32)
    y = y + b_ref[...].astype(jnp.float32)
    o_ref[...] = y.astype(o_ref.dtype)


def linear(x2d, w, b, *, tm_target=512, tn_target=512):
    """x2d: (M, d_in); w: (d_in, d_out); b: (d_out,). Returns (M, d_out)."""
    M, d_in = x2d.shape
    d_out = w.shape[1]

    # Row tile: pick n_tiles first, then the smallest multiple-of-8 tile that covers M,
    # so padding is minimal (e.g. M=300 -> tm=304, not 512).
    nmt = _cdiv(M, tm_target)
    tm = _round_up(_cdiv(M, nmt), 8)
    M_pad = nmt * tm
    if M_pad != M:
        x2d = jnp.pad(x2d, ((0, M_pad - M), (0, 0)))

    # Column tile: stream the weight in (d_in, tn) slabs when d_out is large so it
    # never has to sit fully resident in VMEM (mandatory headroom on v7x's 64 MiB).
    if d_out <= tn_target:
        nnt, tn, N_pad = 1, d_out, d_out
    else:
        nnt = _cdiv(d_out, tn_target)
        tn = _round_up(_cdiv(d_out, nnt), 128)
        N_pad = nnt * tn
    if N_pad != d_out:
        w = jnp.pad(w, ((0, 0), (0, N_pad - d_out)))
        b = jnp.pad(b, ((0, N_pad - d_out),))
    # TODO(synk): add a K (d_in) grid axis with an f32 accumulator scratch if d_in is
    # ever large enough that a (d_in, tn) weight slab does not fit VMEM.

    b2d = b.reshape(1, N_pad)

    flops = 2 * M_pad * d_in * N_pad
    bytes_accessed = (M_pad * d_in * x2d.dtype.itemsize
                      + d_in * N_pad * w.dtype.itemsize
                      + N_pad * b.dtype.itemsize
                      + M_pad * N_pad * x2d.dtype.itemsize)

    out = pl.pallas_call(
        linear_kernel,
        out_shape=jax.ShapeDtypeStruct((M_pad, N_pad), x2d.dtype),
        grid_spec=pltpu.PrefetchScalarGridSpec(
            num_scalar_prefetch=0,
            grid=(nmt, nnt),
            in_specs=[
                pl.BlockSpec((tm, d_in), lambda i, j: (i, 0)),   # x row tile
                pl.BlockSpec((d_in, tn), lambda i, j: (0, j)),   # W column slab
                pl.BlockSpec((1, tn), lambda i, j: (0, j)),      # bias slab
            ],
            out_specs=pl.BlockSpec((tm, tn), lambda i, j: (i, j)),
        ),
        compiler_params=pltpu.CompilerParams(
            dimension_semantics=("parallel", "parallel")),
        cost_estimate=pl.CostEstimate(flops=flops, transcendentals=0,
                                      bytes_accessed=bytes_accessed),
    )(x2d, w, b2d)

    return out[:M, :d_out]


# ---------------------------------------------------------------------------
# Attention: (B, Sq, D) x (B, Skv, D) -> (B, Sq, D) in combined-head layout.
# Flash-style online softmax over KV tiles; heads unrolled inside the kernel.
# ---------------------------------------------------------------------------
def attention_kernel(q_ref, k_ref, v_ref, o_ref, acc_ref, m_ref, l_ref, *,
                     num_heads, d_k, scale, kv_len, tkv, needs_mask):
    kv_idx = pl.program_id(1)

    @pl.when(kv_idx == 0)
    def _():
        m_ref[...] = jnp.full(m_ref.shape, -jnp.inf, m_ref.dtype)
        l_ref[...] = jnp.zeros(l_ref.shape, l_ref.dtype)
        acc_ref[...] = jnp.zeros(acc_ref.shape, acc_ref.dtype)

    # 1/sqrt(d_k) folded into Q: S*D multiplies instead of a pass over (S, Skv) scores.
    q = q_ref[...] * scale          # (Sq, D)
    k = k_ref[...]                  # (tkv, D)
    v = v_ref[...]                  # (tkv, D)

    if needs_mask:
        kv_pos = kv_idx * tkv + lax.broadcasted_iota(jnp.int32, (1, tkv), 1)
        kv_valid = kv_pos < kv_len  # (1, tkv), masks zero-padded KV rows

    for h in range(num_heads):      # static unroll; heads share the fetched K/V block
        cols = slice(h * d_k, (h + 1) * d_k)
        q_h, k_h, v_h = q[:, cols], k[:, cols], v[:, cols]

        # 2-D MXU contractions (no dummy batch dim).
        s = lax.dot_general(q_h, k_h, (((1,), (1,)), ((), ())),
                            preferred_element_type=jnp.float32)        # (Sq, tkv)
        if needs_mask:
            s = jnp.where(kv_valid, s, -1e30)

        m_prev = m_ref[:, h:h + 1]
        m_new = jnp.maximum(m_prev, jnp.max(s, axis=-1, keepdims=True))
        alpha = jnp.exp(m_prev - m_new)
        p = jnp.exp(s - m_new)
        l_ref[:, h:h + 1] = alpha * l_ref[:, h:h + 1] + jnp.sum(p, axis=-1, keepdims=True)

        pv = lax.dot_general(p.astype(v_h.dtype), v_h, (((1,), (0,)), ((), ())),
                             preferred_element_type=jnp.float32)       # (Sq, d_k)
        acc_ref[:, cols] = alpha * acc_ref[:, cols] + pv
        m_ref[:, h:h + 1] = m_new

    @pl.when(kv_idx == pl.num_programs(1) - 1)
    def _():
        inv_l = pl.reciprocal(l_ref[...], approx=True)   # (Sq, H), EUP slot
        for h in range(num_heads):
            cols = slice(h * d_k, (h + 1) * d_k)
            o_ref[:, cols] = (acc_ref[:, cols] * inv_l[:, h:h + 1]).astype(o_ref.dtype)


def attention(qp, kp, vp, *, num_heads, kv_tile_target=512):
    """qp: (B, Sq, D); kp/vp: (B, Skv, D). Returns (B, Sq, D), heads combined."""
    B, Sq, D = qp.shape
    Skv = kp.shape[1]
    d_k = D // num_heads
    scale = 1.0 / math.sqrt(d_k)

    # KV tiling (online softmax) so the score matrix is (Sq, tkv), never (Sq, Skv).
    if Skv <= kv_tile_target:
        n_kv, tkv, S_pad = 1, Skv, Skv
    else:
        n_kv = _cdiv(Skv, kv_tile_target)
        tkv = _round_up(_cdiv(Skv, n_kv), 8)
        S_pad = n_kv * tkv
    if S_pad != Skv:
        pad_cfg = ((0, 0), (0, S_pad - Skv), (0, 0))
        kp = jnp.pad(kp, pad_cfg)
        vp = jnp.pad(vp, pad_cfg)
    needs_mask = S_pad != Skv

    kernel = functools.partial(
        attention_kernel, num_heads=num_heads, d_k=d_k, scale=scale,
        kv_len=Skv, tkv=tkv, needs_mask=needs_mask)

    flops = 4 * B * num_heads * Sq * S_pad * d_k
    bytes_accessed = (2 * qp.size + kp.size + vp.size) * qp.dtype.itemsize

    return pl.pallas_call(
        kernel,
        out_shape=jax.ShapeDtypeStruct((B, Sq, D), qp.dtype),
        grid_spec=pltpu.PrefetchScalarGridSpec(
            num_scalar_prefetch=0,
            grid=(B, n_kv),                              # reduction (kv) axis last
            in_specs=[
                pl.BlockSpec((None, Sq, D), lambda b, kv: (b, 0, 0)),   # Q (resident per b)
                pl.BlockSpec((None, tkv, D), lambda b, kv: (b, kv, 0)),  # K tile
                pl.BlockSpec((None, tkv, D), lambda b, kv: (b, kv, 0)),  # V tile
            ],
            out_specs=pl.BlockSpec((None, Sq, D), lambda b, kv: (b, 0, 0)),
            scratch_shapes=[
                pltpu.VMEM((Sq, D), jnp.float32),           # acc (all heads)
                pltpu.VMEM((Sq, num_heads), jnp.float32),   # running max m
                pltpu.VMEM((Sq, num_heads), jnp.float32),   # running sum l
            ],
        ),
        compiler_params=pltpu.CompilerParams(
            dimension_semantics=("parallel", "arbitrary")),
        cost_estimate=pl.CostEstimate(flops=flops,
                                      transcendentals=B * num_heads * Sq * S_pad,
                                      bytes_accessed=bytes_accessed),
    )(qp, kp, vp)


# ---------------------------------------------------------------------------
# Full MultiHeadAttention forward
# ---------------------------------------------------------------------------
def multi_head_attention(q, k, v, params, *, num_heads, mask=None):
    """q/k/v: (B, S, d_model). params: wq/bq/wk/bk/wv/bv/wo/bo,
    each w* stored as (in_features, out_features) = PyTorch weight.T."""
    # TODO(synk): optional attention mask (additive -inf before the running max) not implemented.
    assert mask is None, "mask is not supported by this Pallas kernel"

    B, Sq, D = q.shape
    assert D % num_heads == 0

    def lin(x, w, b):
        return linear(x.reshape(-1, D), w, b)

    if (q is k) and (k is v):
        # Self-attention: fused QKV projection -> read the activation from HBM once.
        w_qkv = jnp.concatenate([params['wq'], params['wk'], params['wv']], axis=1)
        b_qkv = jnp.concatenate([params['bq'], params['bk'], params['bv']])
        y = lin(q, w_qkv, b_qkv)                                   # (B*Sq, 3D)
        Qp, Kp, Vp = (z.reshape(B, Sq, D) for z in jnp.split(y, 3, axis=-1))
    elif k is v:
        # Cross-attention with shared memory tensor: fuse the K/V projections.
        Qp = lin(q, params['wq'], params['bq']).reshape(B, Sq, D)
        w_kv = jnp.concatenate([params['wk'], params['wv']], axis=1)
        b_kv = jnp.concatenate([params['bk'], params['bv']])
        y = lin(k, w_kv, b_kv)
        Kp, Vp = (z.reshape(B, k.shape[1], D) for z in jnp.split(y, 2, axis=-1))
    else:
        Qp = lin(q, params['wq'], params['bq']).reshape(B, Sq, D)
        Kp = lin(k, params['wk'], params['bk']).reshape(B, k.shape[1], D)
        Vp = lin(v, params['wv'], params['bv']).reshape(B, v.shape[1], D)

    # Heads are split/combined via in-kernel column slices: no HBM transposes at all.
    attn = attention(Qp, Kp, Vp, num_heads=num_heads)              # (B, Sq, D)

    out = linear(attn.reshape(B * Sq, D), params['wo'], params['bo'])
    return out.reshape(B, Sq, D)


# ---------------------------------------------------------------------------
# Pure-JAX reference (mirrors the PyTorch module, mask=None path)
# ---------------------------------------------------------------------------
def mha_reference(q, k, v, params, num_heads):
    B, Sq, D = q.shape
    dk = D // num_heads
    Qp = q @ params['wq'] + params['bq']
    Kp = k @ params['wk'] + params['bk']
    Vp = v @ params['wv'] + params['bv']

    def split(x):
        return x.reshape(B, x.shape[1], num_heads, dk).transpose(0, 2, 1, 3)

    Q, K, V = split(Qp), split(Kp), split(Vp)
    s = jnp.einsum('bhqd,bhkd->bhqk', Q, K) / math.sqrt(dk)
    p = jax.nn.softmax(s, axis=-1)
    o = jnp.einsum('bhqk,bhkd->bhqd', p, V)
    o = o.transpose(0, 2, 1, 3).reshape(B, Sq, D)
    return o @ params['wo'] + params['bo']


if __name__ == "__main__":
    d_model, num_heads = 32, 4
    batch, seq = 2, 8

    key = jax.random.PRNGKey(0)
    keys = jax.random.split(key, 12)

    # nn.Linear-style init (uniform +/- 1/sqrt(fan_in)), weights stored as (in, out).
    bound = 1.0 / math.sqrt(d_model)

    def mk_w(k):
        return jax.random.uniform(k, (d_model, d_model), jnp.float32, -bound, bound)

    def mk_b(k):
        return jax.random.uniform(k, (d_model,), jnp.float32, -bound, bound)

    params = {
        'wq': mk_w(keys[0]), 'bq': mk_b(keys[1]),
        'wk': mk_w(keys[2]), 'bk': mk_b(keys[3]),
        'wv': mk_w(keys[4]), 'bv': mk_b(keys[5]),
        'wo': mk_w(keys[6]), 'bo': mk_b(keys[7]),
    }

    x = jax.random.normal(keys[8], (batch, seq, d_model), jnp.float32)
    Q = jax.random.normal(keys[9], (batch, seq, d_model), jnp.float32)
    K = jax.random.normal(keys[10], (batch, seq, d_model), jnp.float32)
    V = jax.random.normal(keys[11], (batch, seq, d_model), jnp.float32)

    # Self-attention: exercises the fused-QKV projection path.
    out_self = jax.block_until_ready(
        multi_head_attention(x, x, x, params, num_heads=num_heads))
    ref_self = mha_reference(x, x, x, params, num_heads)
    assert out_self.shape == (batch, seq, d_model)
    assert jnp.allclose(out_self, ref_self, atol=5e-3, rtol=5e-3)

    # Distinct Q/K/V: exercises the general projection path.
    out_cross = jax.block_until_ready(
        multi_head_attention(Q, K, V, params, num_heads=num_heads))
    ref_cross = mha_reference(Q, K, V, params, num_heads)
    assert out_cross.shape == (batch, seq, d_model)
    assert jnp.allclose(out_cross, ref_cross, atol=5e-3, rtol=5e-3)

    print("KERNEL_OK")
</pallas_src>

<mosaic_0001>
module attributes {stable_mosaic.version = 11 : i64} {
  func.func @linear_kernel(%arg0: i32, %arg1: i32, %arg2: memref<16x32xf32, #tpu.memory_space<vmem>>, %arg3: memref<32x96xf32, #tpu.memory_space<vmem>>, %arg4: memref<1x96xf32, #tpu.memory_space<vmem>>, %arg5: memref<16x96xf32, #tpu.memory_space<vmem>>) attributes {dimension_semantics = [#tpu.dimension_semantics<parallel>, #tpu.dimension_semantics<parallel>], iteration_bounds = array<i64: 1, 1>, scalar_prefetch = 0 : i64, scratch_operands = 0 : i64, tpu.core_type = #tpu.core_type<tc>, window_params = [{transform_indices = @transform_0, window_bounds = array<i64: 16, 32>}, {transform_indices = @transform_1, window_bounds = array<i64: 32, 96>}, {transform_indices = @transform_2, window_bounds = array<i64: 1, 96>}, {transform_indices = @transform_3, window_bounds = array<i64: 16, 96>}]} {
    %c0 = arith.constant 0 : index
    %c0_0 = arith.constant 0 : index
    %0 = vector.load %arg2[%c0, %c0_0] : memref<16x32xf32, #tpu.memory_space<vmem>>, vector<16x32xf32>
    %c0_1 = arith.constant 0 : index
    %c0_2 = arith.constant 0 : index
    %1 = vector.load %arg3[%c0_1, %c0_2] : memref<32x96xf32, #tpu.memory_space<vmem>>, vector<32x96xf32>
    %cst = arith.constant dense<0.000000e+00> : vector<16x96xf32>
    %2 = tpu.matmul %0, %1, %cst {dimension_numbers = #tpu.dot_dimension_numbers<[1], [0], [0], [1], [0, 0, 1, 1], [], []>} : vector<16x32xf32>, vector<32x96xf32>, vector<16x96xf32> -> vector<16x96xf32>
    %c0_3 = arith.constant 0 : index
    %c0_4 = arith.constant 0 : index
    %3 = vector.load %arg4[%c0_3, %c0_4] : memref<1x96xf32, #tpu.memory_space<vmem>>, vector<1x96xf32>
    %4 = vector.broadcast %3 : vector<1x96xf32> to vector<16x96xf32>
    %5 = arith.addf %2, %4 : vector<16x96xf32>
    %c0_5 = arith.constant 0 : index
    %c0_6 = arith.constant 0 : index
    %6 = vector.load %arg5[%c0_5, %c0_6] : memref<16x96xf32, #tpu.memory_space<vmem>>, vector<16x96xf32>
    tpu.vector_store %arg5[%c0_5, %c0_6], %5 {strides = array<i32>} : memref<16x96xf32, #tpu.memory_space<vmem>>, vector<16x96xf32>,
    return
  }
  func.func @transform_0(%arg0: i32, %arg1: i32) -> (i32, i32) {
    %c0_i32 = arith.constant 0 : i32
    %c0_i32_0 = arith.constant 0 : i32
    return %arg0, %c0_i32 : i32, i32
  }
  func.func @transform_1(%arg0: i32, %arg1: i32) -> (i32, i32) {
    %c0_i32 = arith.constant 0 : i32
    %c0_i32_0 = arith.constant 0 : i32
    return %c0_i32, %arg1 : i32, i32
  }
  func.func @transform_2(%arg0: i32, %arg1: i32) -> (i32, i32) {
    %c0_i32 = arith.constant 0 : i32
    %c0_i32_0 = arith.constant 0 : i32
    return %c0_i32, %arg1 : i32, i32
  }
  func.func @transform_3(%arg0: i32, %arg1: i32) -> (i32, i32) {
    %c0_i32 = arith.constant 0 : i32
    return %arg0, %arg1 : i32, i32
  }
}

</mosaic_0001>

<bundles_post_ra>
// kernel: tpu_custom_call.1
= control target key start
LH: loop header
LB: loop body
LE: loop exit
PB: predicated region body
PF: predicated region fallthrough
CT: control target
= control target key end

     0   :  { %8 = vsyncpa [#allocation3], 0  ;;  %s298_s0 = inlined_call_operand.hbm [shape: f32[16,32], index: 0, kind: input, shape index: {}]   ;;  %s299_s1 = inlined_call_operand.hbm [shape: f32[32,96], index: 1, kind: input, shape index: {}]   ;;  %s300_s2 = inlined_call_operand.vmem [shape: f32[1,96], index: 2, kind: input, shape index: {}]   ;;  %s301_s3 = inlined_call_operand.hbm [shape: f32[16,96], index: 3, kind: output, shape index: {}]  }
   0x1   :  { %9 = vsyncpa [#allocation6], 0 }
   0x2   :  { %10 = vsyncpa [#allocation4], 0  ;;  %s250_s12 = smov [#allocation2]  }
   0x3   :  { %s16_s13 = sshll.u32 %s250_s12, 4  ;;  %s17_s13 = int_to_ptr.vmem [resolvable:$true] %s16_s13 }
   0x4   :  { %s192_s14 = scalar_lea.vmem %s17_s13, 256  ;;  %p197_p1 = scmp.lt.s32.totalorder %s17_s13, %s17_s13 }
   0x5   :  { %p193_p0 = scmp.ne.s32.totalorder %s17_s13, %s192_s14  ;;  %p198_p2 = scmp.lt.s32.totalorder %s192_s14, %s192_s14 }
   0x7   :  { %p199_p3 = por %p198_p2, %p197_p1 }
   0x9   :  { %p200_p4 = pnand %p199_p3, %p193_p0 }
   0xb   :  { %203 = shalt.err (!%p200_p4)
}
   0xc   :  { %s251_s15 = smov 128   ;;  %s252_s16 = smov 8  }
   0xd   :  { %22 = dma.hbm_to_vmem [thread:$0]  %s298_s0, 256, %s17_s13, [#allocation3], %s251_s15, %s251_s15, %s252_s16  }
   0xe   :  { %s253_s19 = smov [#allocation5]  }
   0xf   :  { %s28_s20 = sshll.u32 %s253_s19, 4  ;;  %s29_s20 = int_to_ptr.vmem [resolvable:$true] %s28_s20 }
  0x10   :  { %s212_s21 = scalar_lea.vmem %s29_s20, 512  ;;  %p217_p6 = scmp.lt.s32.totalorder %s29_s20, %s29_s20 }
  0x11   :  { %p213_p5 = scmp.ne.s32.totalorder %s29_s20, %s212_s21  ;;  %p218_p7 = scmp.lt.s32.totalorder %s212_s21, %s212_s21 }
  0x13   :  { %p219_p8 = por %p218_p7, %p217_p6 }
  0x15   :  { %p220_p9 = pnand %p219_p8, %p213_p5 }
  0x17   :  { %223 = shalt.err (!%p220_p9)
}
  0x18   :  { %34 = dma.hbm_to_vmem [thread:$0]  %s299_s1, 512, %s29_s20, [#allocation6], %s251_s15, %s251_s15, %s252_s16  }
  0x19   :  { %244 = dma.done.wait [#allocation3], 256  }
  0x1a   :  { %245 = vsyncadd [#allocation3], 4294967040 }
  0x1b   :  { %246 = dma.done.wait [#allocation6], 512  }
  0x1c   :  { %247 = vsyncadd [#allocation6], 4294966784  ;;  %vm56_vm0 = vcmask 261120   ;;  %v48_v0 = vld [vmem:[#allocation5 + $0x18] sm:$0xff]  ;;  %v47_v1 = vld [vmem:[#allocation5 + $0x10] sm:$0xff]  ;;  %vm138_vm1 = vcmask 785408  }
  0x1d   :  { %168 = vmatprep.subr.mxu0 %v48_v0  ;;  %v43_v2 = vld [vmem:[#allocation2] sm:$0xff]  ;;  %v46_v3 = vld [vmem:[#allocation5 + $0x8] sm:$0xff]  ;;  %v45_v4 = vld [vmem:[#allocation5] sm:$0xff]  ;;  %s254_s24 = smov [#allocation7]  }
  0x1e   :  { %169 = vmatpush3.msra.mxu0 %v48_v0  ;;  %176 = vmatprep.mubr.msk.f32.mxu0 %vm56_vm0, %v43_v2  ;;  %v44_v5 = vld [vmem:[#allocation2 + $0x8] sm:$0xff]  ;;  %v159_v6 = vld [vmem:[%s300_s2] ss:$0 sm:$0xff]  ;;  %s146_s25 = sshll.u32 %s254_s24, 4  ;;  %s147_s25 = int_to_ptr.vmem [resolvable:$true] %s146_s25 }
  0x1f   :  { %170 = vmatprep.subr.mxu0 %v47_v1  ;;  %s224_s26 = scalar_lea.vmem %s147_s25, 256  ;;  %p229_p11 = scmp.lt.s32.totalorder %s147_s25, %s147_s25 }
  0x20   :  { %171 = vmatpush3.msra.mxu0 %v47_v1  ;;  %p225_p10 = scmp.ne.s32.totalorder %s147_s25, %s224_s26  ;;  %p230_p12 = scmp.lt.s32.totalorder %s224_s26, %s224_s26 }
  0x21   :  { %172 = vmatprep.subr.mxu0 %v46_v3 }
  0x22   :  { %173 = vmatpush3.msra.mxu0 %v46_v3  ;;  %p231_p13 = por %p230_p12, %p229_p11 }
  0x23   :  { %174 = vmatprep.subr.mxu0 %v45_v4 }
  0x24   :  { %175 = vmatpush3.msra.mxu0 %v45_v4  ;;  %p232_p0 = pnand %p231_p13, %p225_p10 }
  0x25   :  { %177 = vmatmul.mubr.msk.f32.vlgmr.msra.gmra.mxu0 %vm56_vm0, %v44_v5 }
  0xe5   :  { %v178_v7 = vpop.f32.mrf.mxu0 }
  0xe6   :  { %v135_v8 = vadd.f32 %v178_v7, %v159_v6 }
  0xe7   :  { %v129_v9 = vpop.f32.mrf.mxu0 }
  0xe8   :  { %v130_v10 = vadd.f32 %v159_v6, %v129_v9  ;;  %140 = vst.msk [vmem:[#allocation7 + $0x8] sm:$0xff] %vm138_vm1, %v135_v8 }
  0xea   :  { %139 = vst.msk [vmem:[#allocation7] sm:$0xff] %vm138_vm1, %v130_v10 }
  0xeb   :  { %235 = shalt.err (!%p232_p0)
}
  0xec   :  { %152 = dma.vmem_to_hbm [thread:$0]  %s147_s25, 256, %s301_s3, [#allocation4], %s251_s15, %s251_s15, %s252_s16  }
  0xed   :  { %248 = dma.done.wait [#allocation4], 256  }
  0xee   :  { %249 = vsyncadd [#allocation4], 4294967040 }
  0xef   :  { %156 = vsyncpa [#allocation3], 1 }
  0xf0   :  { %157 = vsyncpa [#allocation6], 1 }
  0xf1   :  { %158 = vsyncpa [#allocation4], 1 }

</bundles_post_ra>
